<compile_context>
chip_gen: v5e
topology: v5e:2x2
jax: 0.10.0
libtpu: 0.0.40
codegen_flags: <defaults>
</compile_context>

<pallas_src>
import functools

import jax
import jax.numpy as jnp
from jax import lax
from jax.experimental import pallas as pl
from jax.experimental.pallas import tpu as pltpu

BN_EPS = 1e-5
LANE = 128                     # hidden feature dims padded to this (lane/MXU dense)
SMALL_BATCH = 512              # below this: single no-grid invocation
MAX_BATCH_TILE = 2048          # cap on rows per grid step
NUM_TC = 2                     # v7x TensorCores per chip (harmless on v5e/v6e)
COMPUTE_DTYPE = jnp.bfloat16   # MXU operand dtype; accumulation is always f32


def _round_up(x, m):
    return (x + m - 1) // m * m


# ---------------------------------------------------------------------------
# Pallas kernel: the whole MLP (matmul + bias (+ ReLU) per layer) in one call.
# ---------------------------------------------------------------------------
def _fused_mlp_kernel(*refs, n_layers, compute_dtype):
    """refs = (x, W0, b0, W1, b1, ..., W_{L-1}, b_{L-1}, out_t).

    Hidden layers: h = relu(h @ W_l + b_l), bf16 MXU operands, f32 accumulator,
    bias/ReLU on the f32 accumulator.  The final layer is emitted transposed
    (contract the hidden dim of both operands) so the output tile is
    (out_size, batch_tile): lane-dense in *useful* lanes.  Eval-mode BN affines
    are pre-folded into (W, b); dropout is identity in eval mode.
    """
    x_ref, o_ref = refs[0], refs[-1]
    wb = refs[1:-1]
    h = x_ref[...]                                        # (tile, d_in) compute_dtype
    for li in range(n_layers - 1):
        w = wb[2 * li][...]                               # (d_in_p, d_out_p) compute_dtype
        b = wb[2 * li + 1][...]                           # (1, d_out_p) f32
        h = jnp.dot(h, w, preferred_element_type=jnp.float32) + b
        h = jnp.maximum(h, 0.0).astype(compute_dtype)     # re-pack to feed the next MXU pass
    wf = wb[2 * (n_layers - 1)][...]                      # (out_size, d_last_p), pre-transposed
    bf = wb[2 * (n_layers - 1) + 1][...]                  # (out_size, 1) f32
    out_t = lax.dot_general(                              # contract hidden dim of both operands
        wf, h, dimension_numbers=(((1,), (1,)), ((), ())),
        preferred_element_type=jnp.float32)               # (out_size, tile)
    o_ref[...] = out_t + bf


def _pick_batch_tile(B):
    # Keep >= 2 tiles per TensorCore when possible so ("parallel",) can shard the
    # batch axis across v7x's two cores; tile is a multiple of 128 so the
    # transposed output store is unmasked/lane-dense; cap amortizes per-step
    # bookkeeping while keeping VMEM tiny.
    target = _round_up(pl.cdiv(B, 2 * NUM_TC), LANE)
    return max(LANE, min(MAX_BATCH_TILE, target))


def fused_mlp(x, weights, biases, *, out_size):
    """x: (B, D_in) compute-dtype at its *natural* (unpadded) feature width.
    weights/biases: prepped by prep_operands.  Returns the transposed output
    (out_size, B) in f32."""
    B, D_in = x.shape
    n_layers = len(weights)
    kernel = functools.partial(_fused_mlp_kernel, n_layers=n_layers,
                               compute_dtype=x.dtype)
    flat = []
    for W, b in zip(weights, biases):
        flat += [W, b]

    if B <= SMALL_BATCH:
        # Launch-overhead dominated: single no-grid invocation, everything VMEM-resident.
        vmem = pl.BlockSpec(memory_space=pltpu.MemorySpace.VMEM)
        return pl.pallas_call(
            kernel,
            out_shape=jax.ShapeDtypeStruct((out_size, B), jnp.float32),
            in_specs=[vmem] * (1 + len(flat)),
            out_specs=vmem,
        )(x, *flat)

    batch_tile = _pick_batch_tile(B)
    Bp = _round_up(B, batch_tile)
    if Bp != B:
        x = jnp.pad(x, ((0, Bp - B), (0, 0)))
    # x streams per tile at its natural width (last block dim == full array dim is
    # legal); the tiny weights keep block index (0, 0) and stay VMEM-resident.
    in_specs = [pl.BlockSpec((batch_tile, D_in), lambda i: (i, 0))]
    for W, b in zip(weights, biases):
        # TODO(synk): pin these constant-index blocks to a single VMEM buffer
        # (pipeline_mode) instead of default double-buffering; only ~tens of KiB
        # here, so left as default for API safety.
        in_specs.append(pl.BlockSpec(W.shape, lambda i: (0, 0)))
        in_specs.append(pl.BlockSpec(b.shape, lambda i: (0, 0)))
    out_t = pl.pallas_call(
        kernel,
        out_shape=jax.ShapeDtypeStruct((out_size, Bp), jnp.float32),
        grid=(Bp // batch_tile,),
        in_specs=in_specs,
        out_specs=pl.BlockSpec((out_size, batch_tile), lambda i: (0, i)),
        compiler_params=pltpu.CompilerParams(dimension_semantics=("parallel",)),
    )(x, *flat)
    return out_t[:, :B]


# ---------------------------------------------------------------------------
# Parameters (mirrors the module __init__ shapes; BN running stats randomized
# as if after training so the eval-mode BN fold is actually exercised).
# ---------------------------------------------------------------------------
def init_params(key, embedding_size, num_numeric, output_size, layers):
    def bn_params(k, n):
        kg, kb, km, kv = jax.random.split(k, 4)
        return dict(
            gamma=jax.random.uniform(kg, (n,), jnp.float32, 0.8, 1.2),
            beta=0.05 * jax.random.normal(kb, (n,), jnp.float32),
            mean=0.05 * jax.random.normal(km, (n,), jnp.float32),
            var=jax.random.uniform(kv, (n,), jnp.float32, 0.8, 1.2),
        )

    params = {"emb": [], "linear": [], "bn_hidden": []}
    for ni, nf in embedding_size:                       # nn.Embedding default ~ N(0, 1)
        key, sub = jax.random.split(key)
        params["emb"].append(jax.random.normal(sub, (ni, nf), jnp.float32))

    key, kbn = jax.random.split(key)
    params["bn_num"] = bn_params(kbn, num_numeric)

    emb_dim = sum(nf for _, nf in embedding_size)
    in_size = emb_dim + num_numeric
    for out_size in layers:
        key, kw, kb, kbn = jax.random.split(key, 4)
        bound = 1.0 / float(in_size) ** 0.5
        W = jax.random.uniform(kw, (in_size, out_size), jnp.float32, -bound, bound)
        b = jax.random.uniform(kb, (out_size,), jnp.float32, -bound, bound)
        params["linear"].append((W, b))
        params["bn_hidden"].append(bn_params(kbn, out_size))
        in_size = out_size

    key, kw, kb = jax.random.split(key, 3)
    bound = 1.0 / float(layers[-1]) ** 0.5
    Wf = jax.random.uniform(kw, (layers[-1], output_size), jnp.float32, -bound, bound)
    bf = jax.random.uniform(kb, (output_size,), jnp.float32, -bound, bound)
    params["final"] = (Wf, bf)
    return params


def _bn_affine(bn):
    scale = bn["gamma"] / jnp.sqrt(bn["var"] + BN_EPS)
    shift = bn["beta"] - bn["mean"] * scale
    return scale, shift


def fold_bn_into_linears(params):
    """Fold every eval-mode BN affine into the adjacent Linear.

    Returns (weights, biases) such that layer_l(x) = x @ W_l + b_l (+ReLU for
    every layer except the last) reproduces the module's eval-mode forward.
    """
    emb_dim = sum(e.shape[1] for e in params["emb"])
    n_hidden = len(params["linear"])

    # Layer-0 input affine: identity on embedding cols, numeric BN on the rest.
    ns, nh = _bn_affine(params["bn_num"])
    in_scale = jnp.concatenate([jnp.ones((emb_dim,), jnp.float32), ns])
    in_shift = jnp.concatenate([jnp.zeros((emb_dim,), jnp.float32), nh])

    weights, biases = [], []
    for li, (W, b) in enumerate(list(params["linear"]) + [params["final"]]):
        W = W.astype(jnp.float32)
        b = b.astype(jnp.float32)
        # (x * s + t) @ W + b  ==  x @ (s[:, None] * W) + (t @ W + b)
        weights.append(in_scale[:, None] * W)
        biases.append(b + jnp.sum(in_shift[:, None] * W, axis=0))
        # The hidden BN after this layer's ReLU becomes the NEXT layer's input affine.
        if li < n_hidden:
            in_scale, in_shift = _bn_affine(params["bn_hidden"][li])
    return weights, biases


def prep_operands(weights, biases, compute_dtype=COMPUTE_DTYPE, lane=LANE):
    """Pad hidden feature dims to lane multiples (zero rows/cols + zero bias =>
    results unchanged), cast weights to the MXU operand dtype, keep biases f32.

    Layer 0 keeps its natural K (matches the unpadded streamed x).  The final
    layer is stored transposed (out_size, d_last_p) with an (out_size, 1) bias
    so the kernel can emit a lane-dense transposed output tile."""
    n = len(weights)
    pw, pb = [], []
    for li, (W, b) in enumerate(zip(weights, biases)):
        din, dout = W.shape
        dinp = din if li == 0 else _round_up(din, lane)
        if li < n - 1:
            doutp = _round_up(dout, lane)
            Wp = jnp.pad(W, ((0, dinp - din), (0, doutp - dout)))
            bp = jnp.pad(b, (0, doutp - dout)).reshape(1, doutp)
        else:
            Wp = jnp.pad(W, ((0, dinp - din), (0, 0))).T          # (out_size, d_last_p)
            bp = b.reshape(dout, 1)                               # (out_size, 1)
        pw.append(Wp.astype(compute_dtype))
        pb.append(bp.astype(jnp.float32))
    return pw, pb


# ---------------------------------------------------------------------------
# Forward (Pallas) and pure-JAX references
# ---------------------------------------------------------------------------
def _embed_concat(params, x_cat, x_num):
    # TODO(synk): at very large serving batch, do this gather inside the kernel
    # (scalar-prefetched x_cat + gather on VMEM-resident tables).
    embs = [params["emb"][i][x_cat[:, i]] for i in range(len(params["emb"]))]
    emb_cat = jnp.concatenate(embs, axis=1)            # eval-mode dropout = identity
    return jnp.concatenate([emb_cat, x_num.astype(jnp.float32)], axis=1)


def fare_forward(params, x_cat, x_num):
    """Pallas forward (eval mode)."""
    X = _embed_concat(params, x_cat, x_num)             # (B, emb_dim + num_numeric) f32
    weights, biases = fold_bn_into_linears(params)      # trace-time constant fold
    out_size = weights[-1].shape[1]
    pw, pb = prep_operands(weights, biases)
    out_t = fused_mlp(X.astype(COMPUTE_DTYPE), pw, pb, out_size=out_size)
    return out_t.T                                      # (B, out_size)


def fare_forward_ref(params, x_cat, x_num, precision=None):
    """Straightforward eval-mode semantics of the PyTorch module (pure JAX, f32)."""
    embs = [params["emb"][i][x_cat[:, i]] for i in range(len(params["emb"]))]
    X = jnp.concatenate(embs, axis=1)
    ns, nh = _bn_affine(params["bn_num"])
    h = jnp.concatenate([X, x_num.astype(jnp.float32) * ns + nh], axis=1)
    for li, (W, b) in enumerate(params["linear"]):
        s, t = _bn_affine(params["bn_hidden"][li])
        h = jnp.maximum(jnp.dot(h, W, precision=precision) + b, 0.0) * s + t
    Wf, bf = params["final"]
    return jnp.dot(h, Wf, precision=precision) + bf


def fare_forward_folded_ref(params, x_cat, x_num, compute_dtype=jnp.float32,
                            precision=None):
    """Same folded math as the kernel, pure JAX; optionally with the kernel's
    bf16 operands / f32 accumulation (for tight kernel checks)."""
    X = _embed_concat(params, x_cat, x_num)
    weights, biases = fold_bn_into_linears(params)
    h = X.astype(compute_dtype)
    n = len(weights)
    for li, (W, b) in enumerate(zip(weights, biases)):
        h = jnp.dot(h, W.astype(compute_dtype), precision=precision,
                    preferred_element_type=jnp.float32) + b
        if li < n - 1:
            h = jnp.maximum(h, 0.0).astype(compute_dtype)
    return h


if __name__ == "__main__":
    # Small shapes consistent with the module.
    embedding_size = [(10, 4), (7, 3), (5, 2)]   # (num_categories, embed_dim)
    num_numeric = 7
    output_size = 1
    layers = [32, 16]
    batch = 8

    key = jax.random.PRNGKey(0)
    key, kp, kin_small, kin_big = jax.random.split(key, 4)
    params = init_params(kp, embedding_size, num_numeric, output_size, layers)

    def make_inputs(k, b):
        kc, kn = jax.random.split(k)
        cols = []
        for ni, _ in embedding_size:
            kc, sub = jax.random.split(kc)
            cols.append(jax.random.randint(sub, (b, 1), 0, ni, jnp.int32))
        return (jnp.concatenate(cols, axis=1),
                jax.random.normal(kn, (b, num_numeric), jnp.float32))

    x_cat, x_num = make_inputs(kin_small, batch)        # (8, 3) int32, (8, 7) f32

    fwd = jax.jit(fare_forward)
    out = jax.block_until_ready(fwd(params, x_cat, x_num))
    assert out.shape == (batch, output_size)

    # (1) The trace-time BN fold preserves the module's eval-mode semantics
    #     (pure JAX on both sides, f32-accurate matmuls).
    ref_hp = fare_forward_ref(params, x_cat, x_num, precision="highest")
    folded_hp = fare_forward_folded_ref(params, x_cat, x_num, precision="highest")
    assert jnp.allclose(folded_hp, ref_hp, atol=1e-4, rtol=1e-4), "BN fold mismatch"

    # (2) The kernel matches the identical folded math with the same bf16
    #     operands / f32 accumulation (pure-JAX MXU on the other side).
    folded_bf16 = fare_forward_folded_ref(params, x_cat, x_num,
                                          compute_dtype=COMPUTE_DTYPE)
    assert jnp.allclose(out, folded_bf16, atol=5e-3, rtol=5e-3), \
        "kernel vs folded-bf16 mismatch"

    # (3) End-to-end vs the straightforward f32 reference; tolerance bounded by
    #     the bf16 MXU operand precision.
    assert jnp.allclose(out, ref_hp, atol=5e-2, rtol=5e-2), "kernel vs reference mismatch"

    # Also exercise the batch-tiled ("parallel" grid, lane-dense transposed
    # output) path at a serving-sized batch (tile=256 -> 4 grid steps).
    xb_cat, xb_num = make_inputs(kin_big, 1024)
    out_b = jax.block_until_ready(fwd(params, xb_cat, xb_num))
    assert out_b.shape == (1024, output_size)
    folded_b = fare_forward_folded_ref(params, xb_cat, xb_num,
                                       compute_dtype=COMPUTE_DTYPE)
    assert jnp.allclose(out_b, folded_b, atol=5e-3, rtol=5e-3), "batch-tiled path mismatch"
    ref_b = fare_forward_ref(params, xb_cat, xb_num, precision="highest")
    assert jnp.allclose(out_b, ref_b, atol=5e-2, rtol=5e-2), "batch-tiled vs reference mismatch"

    print("KERNEL_OK")
</pallas_src>

<mosaic_0001>
module attributes {stable_mosaic.version = 11 : i64} {
  func.func @_fused_mlp_kernel(%arg0: memref<8x16xbf16, #tpu.memory_space<vmem>>, %arg1: memref<16x128xbf16, #tpu.memory_space<vmem>>, %arg2: memref<1x128xf32, #tpu.memory_space<vmem>>, %arg3: memref<128x128xbf16, #tpu.memory_space<vmem>>, %arg4: memref<1x128xf32, #tpu.memory_space<vmem>>, %arg5: memref<1x128xbf16, #tpu.memory_space<vmem>>, %arg6: memref<1x1xf32, #tpu.memory_space<vmem>>, %arg7: memref<1x8xf32, #tpu.memory_space<vmem>>) attributes {dimension_semantics = [], scalar_prefetch = 0 : i64, scratch_operands = 0 : i64, tpu.core_type = #tpu.core_type<tc>} {
    %c0 = arith.constant 0 : index
    %c0_0 = arith.constant 0 : index
    %0 = vector.load %arg0[%c0, %c0_0] : memref<8x16xbf16, #tpu.memory_space<vmem>>, vector<8x16xbf16>
    %c0_1 = arith.constant 0 : index
    %c0_2 = arith.constant 0 : index
    %1 = vector.load %arg1[%c0_1, %c0_2] : memref<16x128xbf16, #tpu.memory_space<vmem>>, vector<16x128xbf16>
    %c0_3 = arith.constant 0 : index
    %c0_4 = arith.constant 0 : index
    %2 = vector.load %arg2[%c0_3, %c0_4] : memref<1x128xf32, #tpu.memory_space<vmem>>, vector<1x128xf32>
    %cst = arith.constant dense<0.000000e+00> : vector<8x128xf32>
    %3 = tpu.matmul %0, %1, %cst {dimension_numbers = #tpu.dot_dimension_numbers<[1], [0], [0], [1], [0, 0, 1, 1], [], []>} : vector<8x16xbf16>, vector<16x128xbf16>, vector<8x128xf32> -> vector<8x128xf32>
    %4 = vector.broadcast %2 : vector<1x128xf32> to vector<8x128xf32>
    %5 = arith.addf %3, %4 : vector<8x128xf32>
    %cst_5 = arith.constant 0.000000e+00 : f32
    %6 = vector.broadcast %cst_5 : f32 to vector<8x128xf32>
    %7 = arith.maximumf %5, %6 : vector<8x128xf32>
    %8 = arith.truncf %7 : vector<8x128xf32> to vector<8x128xbf16>
    %c0_6 = arith.constant 0 : index
    %c0_7 = arith.constant 0 : index
    %9 = vector.load %arg3[%c0_6, %c0_7] : memref<128x128xbf16, #tpu.memory_space<vmem>>, vector<128x128xbf16>
    %c0_8 = arith.constant 0 : index
    %c0_9 = arith.constant 0 : index
    %10 = vector.load %arg4[%c0_8, %c0_9] : memref<1x128xf32, #tpu.memory_space<vmem>>, vector<1x128xf32>
    %cst_10 = arith.constant dense<0.000000e+00> : vector<8x128xf32>
    %11 = tpu.matmul %8, %9, %cst_10 {dimension_numbers = #tpu.dot_dimension_numbers<[1], [0], [0], [1], [0, 0, 1, 1], [], []>} : vector<8x128xbf16>, vector<128x128xbf16>, vector<8x128xf32> -> vector<8x128xf32>
    %12 = vector.broadcast %10 : vector<1x128xf32> to vector<8x128xf32>
    %13 = arith.addf %11, %12 : vector<8x128xf32>
    %cst_11 = arith.constant 0.000000e+00 : f32
    %14 = vector.broadcast %cst_11 : f32 to vector<8x128xf32>
    %15 = arith.maximumf %13, %14 : vector<8x128xf32>
    %16 = arith.truncf %15 : vector<8x128xf32> to vector<8x128xbf16>
    %c0_12 = arith.constant 0 : index
    %c0_13 = arith.constant 0 : index
    %17 = vector.load %arg5[%c0_12, %c0_13] : memref<1x128xbf16, #tpu.memory_space<vmem>>, vector<1x128xbf16>
    %c0_14 = arith.constant 0 : index
    %c0_15 = arith.constant 0 : index
    %18 = vector.load %arg6[%c0_14, %c0_15] : memref<1x1xf32, #tpu.memory_space<vmem>>, vector<1x1xf32>
    %cst_16 = arith.constant dense<0.000000e+00> : vector<1x8xf32>
    %19 = tpu.matmul %17, %16, %cst_16 {dimension_numbers = #tpu.dot_dimension_numbers<[1], [1], [0], [0], [0, 0, 1, 0], [], []>} : vector<1x128xbf16>, vector<8x128xbf16>, vector<1x8xf32> -> vector<1x8xf32>
    %20 = vector.broadcast %18 : vector<1x1xf32> to vector<1x8xf32>
    %21 = arith.addf %19, %20 : vector<1x8xf32>
    %c0_17 = arith.constant 0 : index
    %c0_18 = arith.constant 0 : index
    %22 = vector.load %arg7[%c0_17, %c0_18] : memref<1x8xf32, #tpu.memory_space<vmem>>, vector<1x8xf32>
    tpu.vector_store %arg7[%c0_17, %c0_18], %21 {strides = array<i32>} : memref<1x8xf32, #tpu.memory_space<vmem>>, vector<1x8xf32>,
    return
  }
}

</mosaic_0001>

<bundles_post_ra>
// kernel: fare_forward.1
= control target key start
LH: loop header
LB: loop body
LE: loop exit
PB: predicated region body
PF: predicated region fallthrough
CT: control target
= control target key end

     0   :  { %s348_s0 = inlined_call_operand.vmem [shape: bf16[8,16], index: 0, kind: input, shape index: {}]   ;;  %s349_s1 = inlined_call_operand.vmem [shape: bf16[16,128], index: 1, kind: input, shape index: {}]   ;;  %s350_s2 = inlined_call_operand.vmem [shape: f32[1,128], index: 2, kind: input, shape index: {}]   ;;  %s351_s3 = inlined_call_operand.vmem [shape: bf16[128,128], index: 3, kind: input, shape index: {}]   ;;  %s352_s4 = inlined_call_operand.vmem [shape: f32[1,128], index: 4, kind: input, shape index: {}]   ;;  %s353_s5 = inlined_call_operand.vmem [shape: bf16[1,128], index: 5, kind: input, shape index: {}]   ;;  %s354_s6 = inlined_call_operand.<no memory space> [shape: f32[1,1], index: 6, kind: input, shape index: {}]   ;;  %s355_s7 = inlined_call_operand.hbm [shape: f32[1,8], index: 7, kind: output, shape index: {}]  }
   0x1   :  { %v12_v0 = vstv %s354_s6 }
   0x2   :  { %13 = vst [vmem:[#allocation2] sm:$0x1] %v12_v0 }
   0x3   :  { %v221_v1 = vld [vmem:[%s349_s1] sm:$0xff]  ;;  %v229_v2 = vld [vmem:[%s351_s3 + $0x38] sm:$0xff]  ;;  %vm43_vm0 = vcmask 130048   ;;  %v228_v4 = vld [vmem:[%s351_s3 + $0x30] sm:$0xff] }
   0x4   :  { %54 = vmatpush.bf16.msra.mxu0 %v221_v1  ;;  %v30_v3 = vld [vmem:[%s348_s0] sm:$0xf]  ;;  %130 = vmatpush.bf16.msra.mxu1 %v229_v2 }
   0x5   :  { %14 = vsyncpa [#allocation4], 0  ;;  %v227_v5 = vld [vmem:[%s351_s3 + $0x28] sm:$0xff]  ;;  %v226_v6 = vld [vmem:[%s351_s3 + $0x20] sm:$0xff]  ;;  %v261_v18 = vmov 0   ;;  %s262_s24 = smov [#allocation3]  }
   0x6   :  { %v225_v7 = vld [vmem:[%s351_s3 + $0x18] sm:$0xff]  ;;  %v224_v8 = vld [vmem:[%s351_s3 + $0x10] sm:$0xff]  ;;  %v223_v9 = vld [vmem:[%s351_s3 + $0x8] sm:$0xff]  ;;  %232 = vset.pattern.permute.xlu0 %v261_v18  ;;  %s173_s25 = sshll.u32 %s262_s24, 4  ;;  %s175_s28 = sshll.u32 %s355_s7, 4  ;;  %vm166_vm1 = vcmask 57344   ;;  %s174_s25 = int_to_ptr.vmem [resolvable:$true] %s173_s25  ;;  %s176_s28 = int_to_ptr.hbm [resolvable:$true] %s175_s28 }
   0x7   :  { %188 = vmatmul.msk.bf16.vlgmr.msra.gmra.mxu0 %vm43_vm0, %v30_v3  ;;  %v222_v10 = vld [vmem:[%s351_s3] sm:$0xff] }
   0x8   :  { %131 = vmatpush.bf16.msra.mxu1 %v228_v4  ;;  %v233_v11 = vld [vmem:[%s350_s2] ss:$0 sm:$0xff] }
   0x9   :  { %v146_v17 = vld [vmem:[#allocation2] sm:$0x1] }
   0xa   :  { %149 = vperm.xlu0 %232, %v146_v17   ;;  %v234_v19 = vld [vmem:[%s352_s4] ss:$0 sm:$0xff] }
   0xb   :  { %v145_v25 = vld [vmem:[%s353_s5] sm:$0x1] }
   0xc   :  { %132 = vmatpush.bf16.msra.mxu1 %v227_v5 }
  0x10   :  { %133 = vmatpush.bf16.msra.mxu1 %v226_v6 }
  0x14   :  { %134 = vmatpush.bf16.msra.mxu1 %v225_v7 }
  0x18   :  { %135 = vmatpush.bf16.msra.mxu1 %v224_v8 }
  0x1c   :  { %136 = vmatpush.bf16.msra.mxu1 %v223_v9 }
  0x20   :  { %137 = vmatpush.bf16.msra.mxu1 %v222_v10 }
  0x7c   :  { %v150_v26 = vpop.permute.xlu0 %149 }
  0x7d   :  { %v152_v27 = vperm.slane %v150_v26, 0 }
  0x84   :  { %v56_v12 = vpop.f32.mrf.mxu0 }
  0x85   :  { %v57_v13 = vadd.f32 %v233_v11, %v56_v12 }
  0x87   :  { %v60_v14 = vmax.f32 %v57_v13, 0.0 }
  0x89   :  { %v61_v15 = vpack.c.bf16 %v60_v14, %v60_v14 }
  0x8b   :  { %138 = vmatmul.bf16.vlgmr.msra.gmra.mxu1 %v61_v15 }
  0x8c   :  { %v58_v16 = vpop.f32.mrf.mxu0 }
 0x108   :  { %v139_v20 = vpop.f32.mrf.mxu1 }
 0x109   :  { %v140_v21 = vadd.f32 %v234_v19, %v139_v20 }
 0x10b   :  { %v143_v22 = vmax.f32 %v140_v21, 0.0 }
 0x10d   :  { %v144_v23 = vpack.c.bf16 %v143_v22, %v143_v22 }
 0x10f   :  { %160 = vmatpush.bf16.xpose.msra.mxu2 %v144_v23 }
 0x110   :  { %v141_v24 = vpop.f32.mrf.mxu1 }
 0x116   :  { %161 = vmatmul.bf16.vlgmr.msra.gmra.mxu2 %v145_v25 }
 0x199   :  { %v162_v28 = vpop.f32.mrf.mxu2 }
 0x19a   :  { %v163_v29 = vadd.f32 %v162_v28, %v152_v27 }
 0x19c   :  { %167 = vst.msk [vmem:[#allocation3] sm:$0x1] %vm166_vm1, %v163_v29 }
 0x19d   :  { %178 = dma.vmem_to_hbm [thread:$0]  %s174_s25, 16, %s176_s28, [#allocation4]  }
 0x1a1   :  { %v164_v30 = vpop.f32.mrf.mxu2 }
 0x1a2   :  { %259 = dma.done.wait [#allocation4], 16  }
 0x1a3   :  { %260 = vsyncadd [#allocation4], 4294967280 }
 0x1a4   :  { %183 = vsyncpa [#allocation4], 1 }

</bundles_post_ra>
